<compile_context>
chip_gen: v7x
topology: tpu7x:2x2x1
jax: 0.10.0
libtpu: 0.0.40
codegen_flags: <defaults>
</compile_context>

<pallas_src>
import math
import jax
import jax.numpy as jnp
from jax.experimental import pallas as pl
from jax.experimental.pallas import tpu as pltpu

LANE = 128


def _round_up(x, m):
    return ((x + m - 1) // m) * m


# ----------------------------------------------------------------------------
# Pallas kernels
# ----------------------------------------------------------------------------

def _scores_kernel(scorer_ref, z_ref, mask_ref, out_ref):
    """scores_t = scorer_hat @ Z_t^T + mask_t, one t per grid step (lane-dense [1, N])."""
    s = jax.lax.dot_general(
        scorer_ref[...], z_ref[...],
        dimension_numbers=(((1,), (1,)), ((), ())),      # contract on F for both operands
        preferred_element_type=jnp.float32)               # [1, N]
    out_ref[...] = s + mask_ref[...]


def batched_scores(scorer_row, Z_stack, mask3):
    # scorer_row: [1, F] (already divided by ||scorer||), Z_stack: [T, N, F], mask3: [T, 1, N]
    T, N, F = Z_stack.shape
    return pl.pallas_call(
        _scores_kernel,
        out_shape=jax.ShapeDtypeStruct((T, 1, N), jnp.float32),
        grid=(T,),
        in_specs=[
            pl.BlockSpec((1, F), lambda t: (0, 0)),            # scorer (resident)
            pl.BlockSpec((None, N, F), lambda t: (t, 0, 0)),   # Z_t (native layout, streamed)
            pl.BlockSpec((None, 1, N), lambda t: (t, 0, 0)),   # mask_t
        ],
        out_specs=pl.BlockSpec((None, 1, N), lambda t: (t, 0, 0)),
        compiler_params=pltpu.CompilerParams(
            dimension_semantics=("parallel",)),                # no t->t+1 dependency
    )(scorer_row, Z_stack, mask3)


def _gru_seq_kernel(z_ref, q0_ref, m_ref, uh_ref, b_ref, qout_ref, q_scr):
    """Fused mat_GRU_cell recurrence; TB timesteps per grid step, Q resident in VMEM.

    Packing (2 MXU matmuls per timestep, 2r-deep contraction):
      m_ref  = [[Wu, Uu], [Wr, Ur], [Wh, 0]]   (3r x 2r)
      g      = m_ref @ concat(z, q)            -> [Wu z + Uu q ; Wr z + Ur q ; Wh z]
      update = sigmoid(g_u + bu) ; reset = sigmoid(g_r + br)
      h_cap  = tanh(g_h + Uh @ (reset * q) + bh)
      Q     <- (1 - update) * Q + update * h_cap
    """
    rows = q0_ref.shape[0]
    TB = z_ref.shape[0]

    @pl.when(pl.program_id(0) == 0)
    def _():
        q_scr[...] = q0_ref[...]

    m = m_ref[...]        # [3r, 2r]
    uh = uh_ref[...]      # [r, r]
    b = b_ref[...]        # [3, r, cp]

    def step(t, q):
        z = z_ref[t]                                       # [r, cp]
        zq = jnp.concatenate([z, q], axis=0)               # [2r, cp]
        g = jnp.dot(m, zq, preferred_element_type=jnp.float32)  # [3r, cp]
        update = jax.nn.sigmoid(g[:rows] + b[0])
        reset = jax.nn.sigmoid(g[rows:2 * rows] + b[1])
        h_cap = jnp.tanh(
            g[2 * rows:]
            + jnp.dot(uh, reset * q, preferred_element_type=jnp.float32)
            + b[2])
        new_q = (1.0 - update) * q + update * h_cap
        qout_ref[t] = new_q
        return new_q

    q_final = jax.lax.fori_loop(0, TB, step, q_scr[...], unroll=True)
    q_scr[...] = q_final


def gru_sequence(z_topk_pad, Q0_pad, M_stack, Uh, b_pad, TB):
    T_pad, rows, cp = z_topk_pad.shape
    return pl.pallas_call(
        _gru_seq_kernel,
        out_shape=jax.ShapeDtypeStruct((T_pad, rows, cp), jnp.float32),
        grid=(T_pad // TB,),
        in_specs=[
            pl.BlockSpec((TB, rows, cp), lambda i: (i, 0, 0)),    # z_topk chunk (streamed)
            pl.BlockSpec((rows, cp), lambda i: (0, 0)),           # Q0 (resident)
            pl.BlockSpec(M_stack.shape, lambda i: (0, 0)),        # packed [3r,2r] (resident)
            pl.BlockSpec(Uh.shape, lambda i: (0, 0)),             # Uh (resident)
            pl.BlockSpec(b_pad.shape, lambda i: (0, 0, 0)),       # bias stack (resident)
        ],
        out_specs=pl.BlockSpec((TB, rows, cp), lambda i: (i, 0, 0)),
        scratch_shapes=[pltpu.VMEM((rows, cp), jnp.float32)],
        compiler_params=pltpu.CompilerParams(
            dimension_semantics=("arbitrary",)),                  # true recurrence over t
    )(z_topk_pad, Q0_pad, M_stack, Uh, b_pad)


def _gcn_kernel(a_ref, z_ref, q_ref, out_ref):
    """out_t = relu( A_t @ (Z_t @ Q_t) ); bf16 MXU operands, f32 accumulation/output."""
    xw = jnp.dot(z_ref[...], q_ref[...].astype(jnp.bfloat16),
                 preferred_element_type=jnp.float32)              # [N, cp] f32
    out = jnp.dot(a_ref[...], xw.astype(jnp.bfloat16),
                  preferred_element_type=jnp.float32)             # [N, cp] f32
    # TODO(synk): args.activation is user-supplied in the original module; ReLU used here.
    out_ref[...] = jnp.maximum(out, 0.0)


def batched_gcn(A_bf, Z_bf, Q_pad):
    # TODO(synk): GAT_MP / MP classes are not provided in the reference; standard
    # edge-weighted message passing A @ (X @ W) is used as the conv.
    T, N, _ = A_bf.shape
    F = Z_bf.shape[-1]
    cp = Q_pad.shape[-1]
    return pl.pallas_call(
        _gcn_kernel,
        out_shape=jax.ShapeDtypeStruct((T, N, cp), jnp.float32),
        grid=(T,),
        in_specs=[
            pl.BlockSpec((None, N, N), lambda t: (t, 0, 0)),      # A_t (bf16, streamed)
            pl.BlockSpec((None, N, F), lambda t: (t, 0, 0)),      # Z_t (bf16, streamed)
            pl.BlockSpec((None, F, cp), lambda t: (t, 0, 0)),     # Q_t (f32, tiny)
        ],
        out_specs=pl.BlockSpec((None, N, cp), lambda t: (t, 0, 0)),
        compiler_params=pltpu.CompilerParams(
            dimension_semantics=("parallel",),                    # megacore-friendly on v7x
            vmem_limit_bytes=48 * 1024 * 1024),
    )(A_bf, Z_bf, Q_pad)


# ----------------------------------------------------------------------------
# Host-side glue (top-k selection, adjacency construction, parameter init)
# ----------------------------------------------------------------------------

def topk_select(Z_t, scores_t, k):
    """TopK.forward tail: gather top-k rows, scale by tanh(masked score), transpose."""
    vals, idx = jax.lax.top_k(scores_t, k)
    # TODO(synk): -inf filtering + pad_with_last_val needs dynamic shapes; we assume the
    # mask contains no -inf so exactly k valid indices are always selected.
    gathered = jnp.take(Z_t, idx, axis=0)                 # [k, F]
    return (gathered * jnp.tanh(vals)[:, None]).T         # [F, k]


def to_dense_adj(edge_index, edge_weight, num_nodes):
    A = jnp.zeros((num_nodes, num_nodes), jnp.float32)
    return A.at[edge_index[0], edge_index[1]].add(edge_weight)


def init_params(key, in_feats, out_feats):
    r, c = in_feats, out_feats
    ks = jax.random.split(key, 8)

    def unif(k, shape, fan):
        stdv = 1.0 / math.sqrt(fan)
        return jax.random.uniform(k, shape, jnp.float32, -stdv, stdv)

    Wu = unif(ks[2], (r, r), r)
    Uu = unif(ks[3], (r, r), r)
    Wr = unif(ks[4], (r, r), r)
    Ur = unif(ks[5], (r, r), r)
    Wh = unif(ks[6], (r, r), r)
    Uh = unif(ks[7], (r, r), r)
    b = jnp.zeros((r, c), jnp.float32)

    # fused gate weights: [[Wu, Uu], [Wr, Ur], [Wh, 0]]  (3r x 2r)
    M_stack = jnp.concatenate([
        jnp.concatenate([Wu, Uu], axis=1),
        jnp.concatenate([Wr, Ur], axis=1),
        jnp.concatenate([Wh, jnp.zeros((r, r), jnp.float32)], axis=1),
    ], axis=0)

    return {
        'GCN_init_weights': unif(ks[0], (r, c), c),
        'scorer': unif(ks[1], (r, 1), r),
        'Wu': Wu, 'Uu': Uu, 'Wr': Wr, 'Ur': Ur, 'Wh': Wh, 'Uh': Uh,
        'M_stack': M_stack,                               # [3r, 2r]
        'b_stack': jnp.stack([b, b, b], axis=0),          # [3, r, c] (update, reset, htilda)
    }


def grcu_forward(params, A_stack, Z_stack, mask_stack):
    T, N, F = Z_stack.shape
    k = params['GCN_init_weights'].shape[1]               # out_feats = k of TopK
    cp = _round_up(k, LANE)                                # lane-dense padded feature width

    # ---- 1) batched scores (Q-independent), native Z layout, no host transpose ----
    scorer = params['scorer']                              # [F, 1]
    # TODO(synk): no epsilon on the norm, matching the PyTorch reference.
    scorer_row = (scorer / jnp.sqrt(jnp.sum(scorer * scorer))).reshape(1, F)
    mask3 = mask_stack.reshape(T, 1, N)
    scores = batched_scores(scorer_row, Z_stack, mask3).reshape(T, N)

    # ---- 2) top-k selection for all T (hoisted out of the recurrence) ----
    z_topk = jax.vmap(lambda Zt, st: topk_select(Zt, st, k))(Z_stack, scores)  # [T, F, k]

    # ---- 3) fused GRU recurrence over time, TB steps per grid step, padded to 128 lanes ----
    TB = min(T, 8)
    T_pad = _round_up(T, TB)
    z_topk_p = jnp.zeros((T_pad, F, cp), jnp.float32).at[:T, :, :k].set(z_topk)
    Q0_p = jnp.zeros((F, cp), jnp.float32).at[:, :k].set(params['GCN_init_weights'])
    b_p = jnp.zeros((3, F, cp), jnp.float32).at[:, :, :k].set(params['b_stack'])
    Q_all_p = gru_sequence(z_topk_p, Q0_p, params['M_stack'], params['Uh'], b_p, TB)
    Q_all_p = Q_all_p[:T]                                  # [T, F, cp] (padded cols stay 0)

    # ---- 4) batched GCN conv (parallel over T, bf16 operands / f32 accumulation) ----
    out_p = batched_gcn(A_stack.astype(jnp.bfloat16),
                        Z_stack.astype(jnp.bfloat16),
                        Q_all_p)                           # [T, N, cp]
    return out_p[:, :, :k]                                 # slice lane padding back off


# ----------------------------------------------------------------------------
# Pure-JAX reference (same semantics, f32 throughout) for a correctness check
# ----------------------------------------------------------------------------

def grcu_reference(params, A_stack, Z_stack, mask_stack):
    T, N, F = Z_stack.shape
    k = params['GCN_init_weights'].shape[1]
    scorer = params['scorer']
    Q = params['GCN_init_weights']
    bu, br, bh = params['b_stack'][0], params['b_stack'][1], params['b_stack'][2]
    outs = []
    for t in range(T):
        Z = Z_stack[t]
        scores = (Z @ scorer) / jnp.sqrt(jnp.sum(scorer * scorer)) + mask_stack[t][:, None]
        z_topk = topk_select(Z, scores[:, 0], k)           # [F, k]
        update = jax.nn.sigmoid(params['Wu'] @ z_topk + params['Uu'] @ Q + bu)
        reset = jax.nn.sigmoid(params['Wr'] @ z_topk + params['Ur'] @ Q + br)
        h_cap = jnp.tanh(params['Wh'] @ z_topk + params['Uh'] @ (reset * Q) + bh)
        Q = (1.0 - update) * Q + update * h_cap
        outs.append(jnp.maximum(A_stack[t] @ (Z @ Q), 0.0))
    return jnp.stack(outs)


# ----------------------------------------------------------------------------
# Main
# ----------------------------------------------------------------------------

if __name__ == "__main__":
    key = jax.random.PRNGKey(0)
    N = 16          # nodes
    in_feats = 8    # rows
    out_feats = 4   # cols (= k of TopK)
    T = 3           # timesteps
    E = 32          # edges per timestep

    k_param, k_data = jax.random.split(key)
    params = init_params(k_param, in_feats, out_feats)

    A_list, Z_list, mask_list = [], [], []
    for t in range(T):
        k_data, kz, km, ke, kw = jax.random.split(k_data, 5)
        Z_list.append(jax.random.normal(kz, (N, in_feats), jnp.float32))
        # finite mask (0 / small negatives), no -inf padding nodes
        mask_list.append(
            -1.0 * jax.random.bernoulli(km, 0.25, (N,)).astype(jnp.float32))
        edge_index = jax.random.randint(ke, (2, E), 0, N)
        edge_weight = jax.random.uniform(kw, (E,), jnp.float32, 0.1, 1.0)
        A_list.append(to_dense_adj(edge_index, edge_weight, N))

    A_stack = jnp.stack(A_list)        # [T, N, N]
    Z_stack = jnp.stack(Z_list)        # [T, N, F]
    mask_stack = jnp.stack(mask_list)  # [T, N]

    out = jax.jit(grcu_forward)(params, A_stack, Z_stack, mask_stack)
    out = jax.block_until_ready(out)

    ref = grcu_reference(params, A_stack, Z_stack, mask_stack)

    assert out.shape == (T, N, out_feats)
    assert bool(jnp.all(jnp.isfinite(out)))
    assert bool(jnp.allclose(out, ref, atol=5e-2, rtol=5e-2))  # bf16 GCN operands -> loose tol

    print("KERNEL_OK")
</pallas_src>

<mosaic_0001>
module attributes {stable_mosaic.version = 11 : i64} {
  func.func @_scores_kernel(%arg0: i32, %arg1: memref<1x8xf32, #tpu.memory_space<vmem>>, %arg2: memref<1x16x8xf32, #tpu.memory_space<vmem>>, %arg3: memref<1x1x16xf32, #tpu.memory_space<vmem>>, %arg4: memref<1x1x16xf32, #tpu.memory_space<vmem>>) attributes {dimension_semantics = [#tpu.dimension_semantics<parallel>], iteration_bounds = array<i64: 3>, scalar_prefetch = 0 : i64, scratch_operands = 0 : i64, tpu.core_type = #tpu.core_type<tc>, window_params = [{pipeline_mode = #tpu.pipeline_mode<synchronous>, transform_indices = @transform_0, window_bounds = array<i64: 1, 8>}, {transform_indices = @transform_1, window_bounds = array<i64: 1, 16, 8>}, {transform_indices = @transform_2, window_bounds = array<i64: 1, 1, 16>}, {transform_indices = @transform_3, window_bounds = array<i64: 1, 1, 16>}]} {
    %c0 = arith.constant 0 : index
    %c0_0 = arith.constant 0 : index
    %0 = vector.load %arg1[%c0, %c0_0] : memref<1x8xf32, #tpu.memory_space<vmem>>, vector<1x8xf32>
    %c0_1 = arith.constant 0 : index
    %c0_2 = arith.constant 0 : index
    %c0_3 = arith.constant 0 : index
    %1 = vector.load %arg2[%c0_1, %c0_2, %c0_3] : memref<1x16x8xf32, #tpu.memory_space<vmem>>, vector<1x16x8xf32>
    %2 = vector.shape_cast %1 : vector<1x16x8xf32> to vector<16x8xf32>
    %cst = arith.constant dense<0.000000e+00> : vector<1x16xf32>
    %3 = tpu.matmul %0, %2, %cst {dimension_numbers = #tpu.dot_dimension_numbers<[1], [1], [0], [0], [0, 0, 1, 0], [], []>} : vector<1x8xf32>, vector<16x8xf32>, vector<1x16xf32> -> vector<1x16xf32>
    %c0_4 = arith.constant 0 : index
    %c0_5 = arith.constant 0 : index
    %c0_6 = arith.constant 0 : index
    %4 = vector.load %arg3[%c0_4, %c0_5, %c0_6] : memref<1x1x16xf32, #tpu.memory_space<vmem>>, vector<1x1x16xf32>
    %5 = vector.shape_cast %4 : vector<1x1x16xf32> to vector<1x16xf32>
    %6 = arith.addf %3, %5 : vector<1x16xf32>
    %c0_7 = arith.constant 0 : index
    %c0_8 = arith.constant 0 : index
    %c0_9 = arith.constant 0 : index
    %7 = vector.load %arg4[%c0_7, %c0_8, %c0_9] : memref<1x1x16xf32, #tpu.memory_space<vmem>>, vector<1x1x16xf32>
    %8 = vector.shape_cast %7 : vector<1x1x16xf32> to vector<1x16xf32>
    %9 = vector.shape_cast %6 : vector<1x16xf32> to vector<1x1x16xf32>
    tpu.vector_store %arg4[%c0_7, %c0_8, %c0_9], %9 {strides = array<i32>} : memref<1x1x16xf32, #tpu.memory_space<vmem>>, vector<1x1x16xf32>,
    return
  }
  func.func @transform_0(%arg0: i32) -> (i32, i32) {
    %c0_i32 = arith.constant 0 : i32
    %c0_i32_0 = arith.constant 0 : i32
    %c0_i32_1 = arith.constant 0 : i32
    return %c0_i32, %c0_i32_0 : i32, i32
  }
  func.func @transform_1(%arg0: i32) -> (i32, i32, i32) {
    %c0_i32 = arith.constant 0 : i32
    %c0_i32_0 = arith.constant 0 : i32
    %c0_i32_1 = arith.constant 0 : i32
    return %arg0, %c0_i32, %c0_i32_0 : i32, i32, i32
  }
  func.func @transform_2(%arg0: i32) -> (i32, i32, i32) {
    %c0_i32 = arith.constant 0 : i32
    %c0_i32_0 = arith.constant 0 : i32
    %c0_i32_1 = arith.constant 0 : i32
    return %arg0, %c0_i32, %c0_i32_0 : i32, i32, i32
  }
  func.func @transform_3(%arg0: i32) -> (i32, i32, i32) {
    %c0_i32 = arith.constant 0 : i32
    %c0_i32_0 = arith.constant 0 : i32
    %c0_i32_1 = arith.constant 0 : i32
    return %arg0, %c0_i32, %c0_i32_0 : i32, i32, i32
  }
}

module attributes {stable_mosaic.version = 11 : i64} {
  func.func @_gru_seq_kernel(%arg0: i32, %arg1: memref<3x8x128xf32, #tpu.memory_space<vmem>>, %arg2: memref<8x128xf32, #tpu.memory_space<vmem>>, %arg3: memref<24x16xf32, #tpu.memory_space<vmem>>, %arg4: memref<8x8xf32, #tpu.memory_space<vmem>>, %arg5: memref<3x8x128xf32, #tpu.memory_space<vmem>>, %arg6: memref<3x8x128xf32, #tpu.memory_space<vmem>>, %arg7: memref<8x128xf32, #tpu.memory_space<vmem>>) attributes {dimension_semantics = [#tpu.dimension_semantics<arbitrary>], iteration_bounds = array<i64: 1>, scalar_prefetch = 0 : i64, scratch_operands = 1 : i64, tpu.core_type = #tpu.core_type<tc>, window_params = [{transform_indices = @transform_0, window_bounds = array<i64: 3, 8, 128>}, {pipeline_mode = #tpu.pipeline_mode<synchronous>, transform_indices = @transform_1, window_bounds = array<i64: 8, 128>}, {pipeline_mode = #tpu.pipeline_mode<synchronous>, transform_indices = @transform_2, window_bounds = array<i64: 24, 16>}, {pipeline_mode = #tpu.pipeline_mode<synchronous>, transform_indices = @transform_3, window_bounds = array<i64: 8, 8>}, {pipeline_mode = #tpu.pipeline_mode<synchronous>, transform_indices = @transform_4, window_bounds = array<i64: 3, 8, 128>}, {transform_indices = @transform_5, window_bounds = array<i64: 3, 8, 128>}]} {
    %c0_i32 = arith.constant 0 : i32
    %0 = arith.cmpi eq, %arg0, %c0_i32 : i32
    %1 = arith.extui %0 : i1 to i32
    %c0_i32_0 = arith.constant 0 : i32
    %2 = arith.cmpi ne, %1, %c0_i32_0 : i32
    scf.if %2 {
      %c0_38 = arith.constant 0 : index
      %c0_39 = arith.constant 0 : index
      %128 = vector.load %arg2[%c0_38, %c0_39] : memref<8x128xf32, #tpu.memory_space<vmem>>, vector<8x128xf32>
      %c0_40 = arith.constant 0 : index
      %c0_41 = arith.constant 0 : index
      %129 = vector.load %arg7[%c0_40, %c0_41] : memref<8x128xf32, #tpu.memory_space<vmem>>, vector<8x128xf32>
      tpu.vector_store %arg7[%c0_40, %c0_41], %128 {strides = array<i32>} : memref<8x128xf32, #tpu.memory_space<vmem>>, vector<8x128xf32>,
    } else {
    }
    %c0 = arith.constant 0 : index
    %c0_1 = arith.constant 0 : index
    %3 = vector.load %arg3[%c0, %c0_1] : memref<24x16xf32, #tpu.memory_space<vmem>>, vector<24x16xf32>
    %c0_2 = arith.constant 0 : index
    %c0_3 = arith.constant 0 : index
    %4 = vector.load %arg4[%c0_2, %c0_3] : memref<8x8xf32, #tpu.memory_space<vmem>>, vector<8x8xf32>
    %c0_4 = arith.constant 0 : index
    %c0_5 = arith.constant 0 : index
    %c0_6 = arith.constant 0 : index
    %5 = vector.load %arg5[%c0_4, %c0_5, %c0_6] : memref<3x8x128xf32, #tpu.memory_space<vmem>>, vector<3x8x128xf32>
    %c0_7 = arith.constant 0 : index
    %c0_8 = arith.constant 0 : index
    %6 = vector.load %arg7[%c0_7, %c0_8] : memref<8x128xf32, #tpu.memory_space<vmem>>, vector<8x128xf32>
    %c0_i32_9 = arith.constant 0 : i32
    %7 = arith.index_cast %c0_i32_9 : i32 to index
    %c0_10 = arith.constant 0 : index
    %c0_11 = arith.constant 0 : index
    %8 = vector.load %arg1[%7, %c0_10, %c0_11] : memref<3x8x128xf32, #tpu.memory_space<vmem>>, vector<1x8x128xf32>
    %9 = vector.shape_cast %8 : vector<1x8x128xf32> to vector<8x128xf32>
    %10 = tpu.concatenate %9, %6 in 0 : vector<8x128xf32>, vector<8x128xf32> -> vector<16x128xf32>
    %cst = arith.constant dense<0.000000e+00> : vector<24x128xf32>
    %11 = tpu.matmul %3, %10, %cst {dimension_numbers = #tpu.dot_dimension_numbers<[1], [0], [0], [1], [0, 0, 1, 1], [], []>} : vector<24x16xf32>, vector<16x128xf32>, vector<24x128xf32> -> vector<24x128xf32>
    %12 = vector.extract_strided_slice %11 {offsets = [0, 0], sizes = [8, 128], strides = [1, 1]} : vector<24x128xf32> to vector<8x128xf32>
    %13 = vector.extract_strided_slice %5 {offsets = [0, 0, 0], sizes = [1, 8, 128], strides = [1, 1, 1]} : vector<3x8x128xf32> to vector<1x8x128xf32>
    %14 = vector.shape_cast %13 : vector<1x8x128xf32> to vector<8x128xf32>
    %15 = arith.addf %12, %14 : vector<8x128xf32>
    %16 = arith.negf %15 : vector<8x128xf32>
    %17 = math.exp %16 : vector<8x128xf32>
    %cst_12 = arith.constant 1.000000e+00 : f32
    %18 = vector.broadcast %cst_12 : f32 to vector<8x128xf32>
    %19 = arith.addf %18, %17 : vector<8x128xf32>
    %20 = arith.divf %18, %19 : vector<8x128xf32>
    %21 = vector.extract_strided_slice %11 {offsets = [8, 0], sizes = [8, 128], strides = [1, 1]} : vector<24x128xf32> to vector<8x128xf32>
    %22 = vector.extract_strided_slice %5 {offsets = [1, 0, 0], sizes = [1, 8, 128], strides = [1, 1, 1]} : vector<3x8x128xf32> to vector<1x8x128xf32>
    %23 = vector.shape_cast %22 : vector<1x8x128xf32> to vector<8x128xf32>
    %24 = arith.addf %21, %23 : vector<8x128xf32>
    %25 = arith.negf %24 : vector<8x128xf32>
    %26 = math.exp %25 : vector<8x128xf32>
    %cst_13 = arith.constant 1.000000e+00 : f32
    %27 = vector.broadcast %cst_13 : f32 to vector<8x128xf32>
    %28 = arith.addf %27, %26 : vector<8x128xf32>
    %29 = arith.divf %27, %28 : vector<8x128xf32>
    %30 = vector.extract_strided_slice %11 {offsets = [16, 0], sizes = [8, 128], strides = [1, 1]} : vector<24x128xf32> to vector<8x128xf32>
    %31 = arith.mulf %29, %6 : vector<8x128xf32>
    %cst_14 = arith.constant dense<0.000000e+00> : vector<8x128xf32>
    %32 = tpu.matmul %4, %31, %cst_14 {dimension_numbers = #tpu.dot_dimension_numbers<[1], [0], [0], [1], [0, 0, 1, 1], [], []>} : vector<8x8xf32>, vector<8x128xf32>, vector<8x128xf32> -> vector<8x128xf32>
    %33 = arith.addf %30, %32 : vector<8x128xf32>
    %34 = vector.extract_strided_slice %5 {offsets = [2, 0, 0], sizes = [1, 8, 128], strides = [1, 1, 1]} : vector<3x8x128xf32> to vector<1x8x128xf32>
    %35 = vector.shape_cast %34 : vector<1x8x128xf32> to vector<8x128xf32>
    %36 = arith.addf %33, %35 : vector<8x128xf32>
    %37 = math.tanh %36 : vector<8x128xf32>
    %cst_15 = arith.constant 1.000000e+00 : f32
    %38 = vector.broadcast %cst_15 : f32 to vector<8x128xf32>
    %39 = arith.subf %38, %20 : vector<8x128xf32>
    %40 = arith.mulf %39, %6 : vector<8x128xf32>
    %41 = arith.mulf %20, %37 : vector<8x128xf32>
    %42 = arith.addf %40, %41 : vector<8x128xf32>
    %43 = arith.index_cast %c0_i32_9 : i32 to index
    %c0_16 = arith.constant 0 : index
    %c0_17 = arith.constant 0 : index
    %44 = vector.load %arg6[%43, %c0_16, %c0_17] : memref<3x8x128xf32, #tpu.memory_space<vmem>>, vector<1x8x128xf32>
    %45 = vector.shape_cast %44 : vector<1x8x128xf32> to vector<8x128xf32>
    %46 = vector.shape_cast %42 : vector<8x128xf32> to vector<1x8x128xf32>
    tpu.vector_store %arg6[%43, %c0_16, %c0_17], %46 {strides = array<i32>} : memref<3x8x128xf32, #tpu.memory_space<vmem>>, vector<1x8x128xf32>,
    %c1_i32 = arith.constant 1 : i32
    %47 = arith.index_cast %c1_i32 : i32 to index
    %c0_18 = arith.constant 0 : index
    %c0_19 = arith.constant 0 : index
    %48 = vector.load %arg1[%47, %c0_18, %c0_19] : memref<3x8x128xf32, #tpu.memory_space<vmem>>, vector<1x8x128xf32>
    %49 = vector.shape_cast %48 : vector<1x8x128xf32> to vector<8x128xf32>
    %50 = tpu.concatenate %49, %42 in 0 : vector<8x128xf32>, vector<8x128xf32> -> vector<16x128xf32>
    %cst_20 = arith.constant dense<0.000000e+00> : vector<24x128xf32>
    %51 = tpu.matmul %3, %50, %cst_20 {dimension_numbers = #tpu.dot_dimension_numbers<[1], [0], [0], [1], [0, 0, 1, 1], [], []>} : vector<24x16xf32>, vector<16x128xf32>, vector<24x128xf32> -> vector<24x128xf32>
    %52 = vector.extract_strided_slice %51 {offsets = [0, 0], sizes = [8, 128], strides = [1, 1]} : vector<24x128xf32> to vector<8x128xf32>
    %53 = vector.extract_strided_slice %5 {offsets = [0, 0, 0], sizes = [1, 8, 128], strides = [1, 1, 1]} : vector<3x8x128xf32> to vector<1x8x128xf32>
    %54 = vector.shape_cast %53 : vector<1x8x128xf32> to vector<8x128xf32>
    %55 = arith.addf %52, %54 : vector<8x128xf32>
    %56 = arith.negf %55 : vector<8x128xf32>
    %57 = math.exp %56 : vector<8x128xf32>
    %cst_21 = arith.constant 1.000000e+00 : f32
    %58 = vector.broadcast %cst_21 : f32 to vector<8x128xf32>
    %59 = arith.addf %58, %57 : vector<8x128xf32>
    %60 = arith.divf %58, %59 : vector<8x128xf32>
    %61 = vector.extract_strided_slice %51 {offsets = [8, 0], sizes = [8, 128], strides = [1, 1]} : vector<24x128xf32> to vector<8x128xf32>
    %62 = vector.extract_strided_slice %5 {offsets = [1, 0, 0], sizes = [1, 8, 128], strides = [1, 1, 1]} : vector<3x8x128xf32> to vector<1x8x128xf32>
    %63 = vector.shape_cast %62 : vector<1x8x128xf32> to vector<8x128xf32>
    %64 = arith.addf %61, %63 : vector<8x128xf32>
    %65 = arith.negf %64 : vector<8x128xf32>
    %66 = math.exp %65 : vector<8x128xf32>
    %cst_22 = arith.constant 1.000000e+00 : f32
    %67 = vector.broadcast %cst_22 : f32 to vector<8x128xf32>
    %68 = arith.addf %67, %66 : vector<8x128xf32>
    %69 = arith.divf %67, %68 : vector<8x128xf32>
    %70 = vector.extract_strided_slice %51 {offsets = [16, 0], sizes = [8, 128], strides = [1, 1]} : vector<24x128xf32> to vector<8x128xf32>
    %71 = arith.mulf %69, %42 : vector<8x128xf32>
    %cst_23 = arith.constant dense<0.000000e+00> : vector<8x128xf32>
    %72 = tpu.matmul %4, %71, %cst_23 {dimension_numbers = #tpu.dot_dimension_numbers<[1], [0], [0], [1], [0, 0, 1, 1], [], []>} : vector<8x8xf32>, vector<8x128xf32>, vector<8x128xf32> -> vector<8x128xf32>
    %73 = arith.addf %70, %72 : vector<8x128xf32>
    %74 = vector.extract_strided_slice %5 {offsets = [2, 0, 0], sizes = [1, 8, 128], strides = [1, 1, 1]} : vector<3x8x128xf32> to vector<1x8x128xf32>
    %75 = vector.shape_cast %74 : vector<1x8x128xf32> to vector<8x128xf32>
    %76 = arith.addf %73, %75 : vector<8x128xf32>
    %77 = math.tanh %76 : vector<8x128xf32>
    %cst_24 = arith.constant 1.000000e+00 : f32
    %78 = vector.broadcast %cst_24 : f32 to vector<8x128xf32>
    %79 = arith.subf %78, %60 : vector<8x128xf32>
    %80 = arith.mulf %79, %42 : vector<8x128xf32>
    %81 = arith.mulf %60, %77 : vector<8x128xf32>
    %82 = arith.addf %80, %81 : vector<8x128xf32>
    %83 = arith.index_cast %c1_i32 : i32 to index
    %c0_25 = arith.constant 0 : index
    %c0_26 = arith.constant 0 : index
    %84 = vector.load %arg6[%83, %c0_25, %c0_26] : memref<3x8x128xf32, #tpu.memory_space<vmem>>, vector<1x8x128xf32>
    %85 = vector.shape_cast %84 : vector<1x8x128xf32> to vector<8x128xf32>
    %86 = vector.shape_cast %82 : vector<8x128xf32> to vector<1x8x128xf32>
    tpu.vector_store %arg6[%83, %c0_25, %c0_26], %86 {strides = array<i32>} : memref<3x8x128xf32, #tpu.memory_space<vmem>>, vector<1x8x128xf32>,
    %c2_i32 = arith.constant 2 : i32
    %87 = arith.index_cast %c2_i32 : i32 to index
    %c0_27 = arith.constant 0 : index
    %c0_28 = arith.constant 0 : index
    %88 = vector.load %arg1[%87, %c0_27, %c0_28] : memref<3x8x128xf32, #tpu.memory_space<vmem>>, vector<1x8x128xf32>
    %89 = vector.shape_cast %88 : vector<1x8x128xf32> to vector<8x128xf32>
    %90 = tpu.concatenate %89, %82 in 0 : vector<8x128xf32>, vector<8x128xf32> -> vector<16x128xf32>
    %cst_29 = arith.constant dense<0.000000e+00> : vector<24x128xf32>
    %91 = tpu.matmul %3, %90, %cst_29 {dimension_numbers = #tpu.dot_dimension_numbers<[1], [0], [0], [1], [0, 0, 1, 1], [], []>} : vector<24x16xf32>, vector<16x128xf32>, vector<24x128xf32> -> vector<24x128xf32>
    %92 = vector.extract_strided_slice %91 {offsets = [0, 0], sizes = [8, 128], strides = [1, 1]} : vector<24x128xf32> to vector<8x128xf32>
    %93 = vector.extract_strided_slice %5 {offsets = [0, 0, 0], sizes = [1, 8, 128], strides = [1, 1, 1]} : vector<3x8x128xf32> to vector<1x8x128xf32>
    %94 = vector.shape_cast %93 : vector<1x8x128xf32> to vector<8x128xf32>
    %95 = arith.addf %92, %94 : vector<8x128xf32>
    %96 = arith.negf %95 : vector<8x128xf32>
    %97 = math.exp %96 : vector<8x128xf32>
    %cst_30 = arith.constant 1.000000e+00 : f32
    %98 = vector.broadcast %cst_30 : f32 to vector<8x128xf32>
    %99 = arith.addf %98, %97 : vector<8x128xf32>
    %100 = arith.divf %98, %99 : vector<8x128xf32>
    %101 = vector.extract_strided_slice %91 {offsets = [8, 0], sizes = [8, 128], strides = [1, 1]} : vector<24x128xf32> to vector<8x128xf32>
    %102 = vector.extract_strided_slice %5 {offsets = [1, 0, 0], sizes = [1, 8, 128], strides = [1, 1, 1]} : vector<3x8x128xf32> to vector<1x8x128xf32>
    %103 = vector.shape_cast %102 : vector<1x8x128xf32> to vector<8x128xf32>
    %104 = arith.addf %101, %103 : vector<8x128xf32>
    %105 = arith.negf %104 : vector<8x128xf32>
    %106 = math.exp %105 : vector<8x128xf32>
    %cst_31 = arith.constant 1.000000e+00 : f32
    %107 = vector.broadcast %cst_31 : f32 to vector<8x128xf32>
    %108 = arith.addf %107, %106 : vector<8x128xf32>
    %109 = arith.divf %107, %108 : vector<8x128xf32>
    %110 = vector.extract_strided_slice %91 {offsets = [16, 0], sizes = [8, 128], strides = [1, 1]} : vector<24x128xf32> to vector<8x128xf32>
    %111 = arith.mulf %109, %82 : vector<8x128xf32>
    %cst_32 = arith.constant dense<0.000000e+00> : vector<8x128xf32>
    %112 = tpu.matmul %4, %111, %cst_32 {dimension_numbers = #tpu.dot_dimension_numbers<[1], [0], [0], [1], [0, 0, 1, 1], [], []>} : vector<8x8xf32>, vector<8x128xf32>, vector<8x128xf32> -> vector<8x128xf32>
    %113 = arith.addf %110, %112 : vector<8x128xf32>
    %114 = vector.extract_strided_slice %5 {offsets = [2, 0, 0], sizes = [1, 8, 128], strides = [1, 1, 1]} : vector<3x8x128xf32> to vector<1x8x128xf32>
    %115 = vector.shape_cast %114 : vector<1x8x128xf32> to vector<8x128xf32>
    %116 = arith.addf %113, %115 : vector<8x128xf32>
    %117 = math.tanh %116 : vector<8x128xf32>
    %cst_33 = arith.constant 1.000000e+00 : f32
    %118 = vector.broadcast %cst_33 : f32 to vector<8x128xf32>
    %119 = arith.subf %118, %100 : vector<8x128xf32>
    %120 = arith.mulf %119, %82 : vector<8x128xf32>
    %121 = arith.mulf %100, %117 : vector<8x128xf32>
    %122 = arith.addf %120, %121 : vector<8x128xf32>
    %123 = arith.index_cast %c2_i32 : i32 to index
    %c0_34 = arith.constant 0 : index
    %c0_35 = arith.constant 0 : index
    %124 = vector.load %arg6[%123, %c0_34, %c0_35] : memref<3x8x128xf32, #tpu.memory_space<vmem>>, vector<1x8x128xf32>
    %125 = vector.shape_cast %124 : vector<1x8x128xf32> to vector<8x128xf32>
    %126 = vector.shape_cast %122 : vector<8x128xf32> to vector<1x8x128xf32>
    tpu.vector_store %arg6[%123, %c0_34, %c0_35], %126 {strides = array<i32>} : memref<3x8x128xf32, #tpu.memory_space<vmem>>, vector<1x8x128xf32>,
    %c3_i32 = arith.constant 3 : i32
    %c0_36 = arith.constant 0 : index
    %c0_37 = arith.constant 0 : index
    %127 = vector.load %arg7[%c0_36, %c0_37] : memref<8x128xf32, #tpu.memory_space<vmem>>, vector<8x128xf32>
    tpu.vector_store %arg7[%c0_36, %c0_37], %122 {strides = array<i32>} : memref<8x128xf32, #tpu.memory_space<vmem>>, vector<8x128xf32>,
    return
  }
  func.func @transform_0(%arg0: i32) -> (i32, i32, i32) {
    %c0_i32 = arith.constant 0 : i32
    %c0_i32_0 = arith.constant 0 : i32
    %c0_i32_1 = arith.constant 0 : i32
    return %arg0, %c0_i32, %c0_i32_0 : i32, i32, i32
  }
  func.func @transform_1(%arg0: i32) -> (i32, i32) {
    %c0_i32 = arith.constant 0 : i32
    %c0_i32_0 = arith.constant 0 : i32
    %c0_i32_1 = arith.constant 0 : i32
    return %c0_i32, %c0_i32_0 : i32, i32
  }
  func.func @transform_2(%arg0: i32) -> (i32, i32) {
    %c0_i32 = arith.constant 0 : i32
    %c0_i32_0 = arith.constant 0 : i32
    %c0_i32_1 = arith.constant 0 : i32
    return %c0_i32, %c0_i32_0 : i32, i32
  }
  func.func @transform_3(%arg0: i32) -> (i32, i32) {
    %c0_i32 = arith.constant 0 : i32
    %c0_i32_0 = arith.constant 0 : i32
    %c0_i32_1 = arith.constant 0 : i32
    return %c0_i32, %c0_i32_0 : i32, i32
  }
  func.func @transform_4(%arg0: i32) -> (i32, i32, i32) {
    %c0_i32 = arith.constant 0 : i32
    %c0_i32_0 = arith.constant 0 : i32
    %c0_i32_1 = arith.constant 0 : i32
    %c0_i32_2 = arith.constant 0 : i32
    return %c0_i32, %c0_i32_0, %c0_i32_1 : i32, i32, i32
  }
  func.func @transform_5(%arg0: i32) -> (i32, i32, i32) {
    %c0_i32 = arith.constant 0 : i32
    %c0_i32_0 = arith.constant 0 : i32
    %c0_i32_1 = arith.constant 0 : i32
    return %arg0, %c0_i32, %c0_i32_0 : i32, i32, i32
  }
}

module attributes {stable_mosaic.version = 11 : i64} {
  func.func @_gcn_kernel(%arg0: i32, %arg1: memref<1x16x16xbf16, #tpu.memory_space<vmem>>, %arg2: memref<1x16x8xbf16, #tpu.memory_space<vmem>>, %arg3: memref<1x8x128xf32, #tpu.memory_space<vmem>>, %arg4: memref<1x16x128xf32, #tpu.memory_space<vmem>>) attributes {dimension_semantics = [#tpu.dimension_semantics<parallel>], iteration_bounds = array<i64: 3>, scalar_prefetch = 0 : i64, scratch_operands = 0 : i64, tpu.core_type = #tpu.core_type<tc>, window_params = [{transform_indices = @transform_0, window_bounds = array<i64: 1, 16, 16>}, {transform_indices = @transform_1, window_bounds = array<i64: 1, 16, 8>}, {transform_indices = @transform_2, window_bounds = array<i64: 1, 8, 128>}, {transform_indices = @transform_3, window_bounds = array<i64: 1, 16, 128>}]} {
    %c0 = arith.constant 0 : index
    %c0_0 = arith.constant 0 : index
    %c0_1 = arith.constant 0 : index
    %0 = vector.load %arg2[%c0, %c0_0, %c0_1] : memref<1x16x8xbf16, #tpu.memory_space<vmem>>, vector<1x16x8xbf16>
    %1 = vector.shape_cast %0 : vector<1x16x8xbf16> to vector<16x8xbf16>
    %c0_2 = arith.constant 0 : index
    %c0_3 = arith.constant 0 : index
    %c0_4 = arith.constant 0 : index
    %2 = vector.load %arg3[%c0_2, %c0_3, %c0_4] : memref<1x8x128xf32, #tpu.memory_space<vmem>>, vector<1x8x128xf32>
    %3 = vector.shape_cast %2 : vector<1x8x128xf32> to vector<8x128xf32>
    %4 = arith.truncf %3 : vector<8x128xf32> to vector<8x128xbf16>
    %cst = arith.constant dense<0.000000e+00> : vector<16x128xf32>
    %5 = tpu.matmul %1, %4, %cst {dimension_numbers = #tpu.dot_dimension_numbers<[1], [0], [0], [1], [0, 0, 1, 1], [], []>} : vector<16x8xbf16>, vector<8x128xbf16>, vector<16x128xf32> -> vector<16x128xf32>
    %c0_5 = arith.constant 0 : index
    %c0_6 = arith.constant 0 : index
    %c0_7 = arith.constant 0 : index
    %6 = vector.load %arg1[%c0_5, %c0_6, %c0_7] : memref<1x16x16xbf16, #tpu.memory_space<vmem>>, vector<1x16x16xbf16>
    %7 = vector.shape_cast %6 : vector<1x16x16xbf16> to vector<16x16xbf16>
    %8 = arith.truncf %5 : vector<16x128xf32> to vector<16x128xbf16>
    %cst_8 = arith.constant dense<0.000000e+00> : vector<16x128xf32>
    %9 = tpu.matmul %7, %8, %cst_8 {dimension_numbers = #tpu.dot_dimension_numbers<[1], [0], [0], [1], [0, 0, 1, 1], [], []>} : vector<16x16xbf16>, vector<16x128xbf16>, vector<16x128xf32> -> vector<16x128xf32>
    %cst_9 = arith.constant 0.000000e+00 : f32
    %10 = vector.broadcast %cst_9 : f32 to vector<16x128xf32>
    %11 = arith.maximumf %9, %10 : vector<16x128xf32>
    %c0_10 = arith.constant 0 : index
    %c0_11 = arith.constant 0 : index
    %c0_12 = arith.constant 0 : index
    %12 = vector.load %arg4[%c0_10, %c0_11, %c0_12] : memref<1x16x128xf32, #tpu.memory_space<vmem>>, vector<1x16x128xf32>
    %13 = vector.shape_cast %12 : vector<1x16x128xf32> to vector<16x128xf32>
    %14 = vector.shape_cast %11 : vector<16x128xf32> to vector<1x16x128xf32>
    tpu.vector_store %arg4[%c0_10, %c0_11, %c0_12], %14 {strides = array<i32>} : memref<1x16x128xf32, #tpu.memory_space<vmem>>, vector<1x16x128xf32>,
    return
  }
  func.func @transform_0(%arg0: i32) -> (i32, i32, i32) {
    %c0_i32 = arith.constant 0 : i32
    %c0_i32_0 = arith.constant 0 : i32
    %c0_i32_1 = arith.constant 0 : i32
    return %arg0, %c0_i32, %c0_i32_0 : i32, i32, i32
  }
  func.func @transform_1(%arg0: i32) -> (i32, i32, i32) {
    %c0_i32 = arith.constant 0 : i32
    %c0_i32_0 = arith.constant 0 : i32
    %c0_i32_1 = arith.constant 0 : i32
    return %arg0, %c0_i32, %c0_i32_0 : i32, i32, i32
  }
  func.func @transform_2(%arg0: i32) -> (i32, i32, i32) {
    %c0_i32 = arith.constant 0 : i32
    %c0_i32_0 = arith.constant 0 : i32
    %c0_i32_1 = arith.constant 0 : i32
    return %arg0, %c0_i32, %c0_i32_0 : i32, i32, i32
  }
  func.func @transform_3(%arg0: i32) -> (i32, i32, i32) {
    %c0_i32 = arith.constant 0 : i32
    %c0_i32_0 = arith.constant 0 : i32
    %c0_i32_1 = arith.constant 0 : i32
    return %arg0, %c0_i32, %c0_i32_0 : i32, i32, i32
  }
}

</mosaic_0001>

<bundles_post_ra>
// kernel: grcu_forward.3
= control target key start
LH: loop header
LB: loop body
LE: loop exit
PB: predicated region body
PF: predicated region fallthrough
CT: control target
= control target key end

     0   :  { %s392_s12 = smov 0   ;;  %s415_s0 = inlined_call_operand.vmem [shape: f32[1,8], index: 0, kind: input, shape index: {}]   ;;  %s416_s1 = inlined_call_operand.vmem [shape: f32[3,16,8], index: 1, kind: input, shape index: {}]   ;;  %s417_s2 = inlined_call_operand.vmem [shape: f32[3,1,16], index: 2, kind: input, shape index: {}]   ;;  %s418_s3 = inlined_call_operand.vmem [shape: f32[3,1,16], index: 3, kind: output, shape index: {}]  }
   0x1 LB: > { %s323_s13 = sadd.s32 4294967295, %s367_s12   ;;  %p327_p0 = scmp.ge.s32.totalorder %s367_s12, 1  ;;  %s367_s12 = sphi %s392_s12, %s13_s12  }
   0x2   : > { %p145_p1 = scmp.lt.s32.totalorder %s367_s12, 4 }
   0x4   : > { %p146_p2 = pnand %p327_p0, %p145_p1 }
   0x5   : > { %p170_p3 = scmp.lt.s32.totalorder (!%p146_p2), %s323_s13, 2  ;;  %v369_v0 = vmov (!%p146_p2), 0.0|0.0   ;;  %vm370_vm0 = vmmov (!%p146_p2), 0   ;;  %v371_v1 = vmov (!%p146_p2), 0.0   ;;  %vm185_vm1 = vcmask (!%p146_p2), 64512  }
   0x6   : > { %149 = sbr.rel (%p146_p2) target bundleno = 241 (0xf1), region = 32  ;;  %346 = vmatprep.subr.bf16.mxu0 (!%p146_p2), %v369_v0  ;;  %343 = vmatprep.mubr.msk.f32.mxu0 (!%p146_p2), %vm370_vm0, %v371_v1  ;;  %vm348_vm2 = vmpackc.low (!%p146_p2), %vm185_vm1, %vm185_vm1  ;;  %v181_v5 = vld [vmem:[%s415_s0] sm:$0x1] (!%p146_p2)  ;;  %vm265_vm3 = vcmask (!%p146_p2), 122880  }
   0xd   : > { %s420_s13 = smov (!%p170_p3, %s323_s13), 2 }
   0xe   : > { %s335_s14 = sshll.u32 %s420_s13, 4  ;;  %s177_s22 = scalar_lea.vmem %s417_s2, %s420_s13 }
   0xf   : > { %s174_s17 = scalar_lea.vmem %s416_s1, %s335_s14  ;;  %v184_v6 = vld [vmem:[%s177_s22] sm:$0x1]  ;;  %s180_s25 = scalar_lea.vmem %s418_s3, %s420_s13 }
  0x10   : > { %v182_v2 = vld [vmem:[%s174_s17] sm:$0xff]  ;;  %v183_v3 = vld [vmem:[%s174_s17 + $0x8] sm:$0xff] }
  0x11   : > { %v347_v4 = vpack.c.bf16 %v183_v3, %v182_v2 }
  0x13   : > { %349 = vmatpush3.bf16.xpose.msk.msra.mxu0 %vm348_vm2, %v347_v4 }
  0x1a   : > { %344 = vmatmul.mubr.msk.f32.vlgmr.msra.gmra.mrb[0].mxu0 %vm185_vm1, %v181_v5 }
  0xed   : > { %v261_v7 = vpop.f32.mrb[0].mxu0 }
  0xee   : > { %v262_v8 = vadd.f32 %v261_v7, %v184_v6  ;;  %v345_v9 = vpop.f32.mrb[1].mxu0 }
  0xf0   : > { %266 = vst.msk [vmem:[%s180_s25] sm:$0x1] %vm265_vm3, %v262_v8 }
  0xf1 PF: > { %s13_s12 = sadd.s32 1, %s367_s12  }
  0xf2   : > { %p10_p4 = scmp.ge.s32.totalorder %s13_s12, 5  }
  0xf4   :  { %12 = sbr.rel (!%p10_p4) target bundleno = 1 (0x1), region = 65 }

// kernel: grcu_forward.5
= control target key start
LH: loop header
LB: loop body
LE: loop exit
PB: predicated region body
PF: predicated region fallthrough
CT: control target
= control target key end

     0   :  { %s482_s12 = smov 0   ;;  %s505_s0 = inlined_call_operand.vmem [shape: bf16[3,16,16], index: 0, kind: input, shape index: {}]   ;;  %s506_s1 = inlined_call_operand.vmem [shape: bf16[3,16,8], index: 1, kind: input, shape index: {}]   ;;  %s507_s2 = inlined_call_operand.vmem [shape: f32[3,8,128], index: 2, kind: input, shape index: {}]   ;;  %s508_s3 = inlined_call_operand.vmem [shape: f32[3,16,128], index: 3, kind: output, shape index: {}]  }
   0x1 LB: > { %s403_s13 = sadd.s32 4294967295, %s458_s12   ;;  %p407_p0 = scmp.ge.s32.totalorder %s458_s12, 1  ;;  %s458_s12 = sphi %s482_s12, %s13_s12  }
   0x2   : > { %p156_p1 = scmp.lt.s32.totalorder %s458_s12, 4 }
   0x4   : > { %p157_p2 = pnand %p407_p0, %p156_p1 }
   0x5   : > { %p189_p3 = scmp.lt.s32.totalorder (!%p157_p2), %s403_s13, 2  ;;  %v460_v0 = vmov (!%p157_p2), 0.0   ;;  %vm461_vm0 = vmmov (!%p157_p2), 0   ;;  %vm222_vm1 = vcmask (!%p157_p2), 1043456   ;;  %vm218_vm2 = vcmask (!%p157_p2), 64512  }
   0x6   : > { %160 = sbr.rel (%p157_p2) target bundleno = 460 (0x1cc), region = 32  ;;  %428 = vmatprep.subr.bf16.mxu0 (!%p157_p2), %v460_v0  ;;  %430 = vmatprep.mubr.msk.bf16.mxu0 (!%p157_p2), %vm461_vm0, %v460_v0  ;;  %vm275_vm3 = vcmask (!%p157_p2), 130048  }
   0x7   : > { %434 = vmatprep.subr.bf16.mxu1 (!%p157_p2), %v460_v0  ;;  %436 = vmatprep.mubr.msk.bf16.mxu1 (!%p157_p2), %vm461_vm0, %v460_v0 }
   0xd   : > { %s510_s13 = smov (!%p189_p3, %s403_s13), 2 }
   0xe   : > { %s421_s14 = sshll.u32 %s510_s13, 3  ;;  %s423_s24 = sshll.u32 %s510_s13, 4 }
   0xf   : > { %s198_s17 = scalar_lea.vmem %s506_s1, %s421_s14  ;;  %s193_s20 = scalar_lea.vmem %s505_s0, %s421_s14 }
  0x10   : > { %s202_s23 = scalar_lea.vmem %s507_s2, %s421_s14  ;;  %v450_v4 = vld [vmem:[%s198_s17] sm:$0xff]   ;;  %s207_s27 = scalar_lea.vmem %s508_s3, %s423_s24 }
  0x11   : > { %v211_v1 = vld [vmem:[%s202_s23] sm:$0xff] }
  0x12   : > { %v212_v2 = vpack.c.bf16 %v211_v1, %v211_v1  ;;  %v451_v10 = vld [vmem:[%s193_s20] sm:$0xff]  }
  0x14   : > { %v224_v3 = vsel %vm222_vm1, %v212_v2, 0 }
  0x15   : > { %429 = vmatpush3.bf16.msra.mxu0 %v224_v3 }
  0x18   : > { %431 = vmatmul.mubr.msk.bf16.vlgmr.msra.gmra.mrb[0].mxu0 %vm218_vm2, %v450_v4 }
  0xeb   : > { %v260_v5 = vpop.f32.mrb[0].mxu0 }
  0xec   : > { %v432_v6 = vpop.f32.mrb[1].mxu0 }
  0xed   : > { %v263_v7 = vpop.f32.mrb[2].mxu0 }
  0xee   : > { %v269_v8 = vpack.c.bf16 %v263_v7, %v260_v5  ;;  %v433_v9 = vpop.f32.mrb[3].mxu0 }
  0xf0   : > { %435 = vmatpush3.bf16.msra.mxu1 %v269_v8 }
  0xf3   : > { %437 = vmatmul.mubr.msk.bf16.vlgmr.msra.gmra.mrb[0].mxu1 %vm275_vm3, %v451_v10 }
 0x1c6   : > { %v313_v11 = vpop.f32.mrb[0].mxu1 }
 0x1c7   : > { %v320_v12 = vmax.f32 %v313_v11, 0.0  ;;  %v438_v13 = vpop.f32.mrb[1].mxu1 }
 0x1c8   : > { %v316_v14 = vpop.f32.mrb[2].mxu1 }
 0x1c9   : > { %322 = vst [vmem:[%s207_s27] sm:$0xff] %v320_v12  ;;  %v321_v15 = vmax.f32 %v316_v14, 0.0  ;;  %v439_v16 = vpop.f32.mrb[3].mxu1 }
 0x1cb   : > { %323 = vst [vmem:[%s207_s27 + $0x8] sm:$0xff] %v321_v15 }
 0x1cc PF: > { %s13_s12 = sadd.s32 1, %s458_s12  }
 0x1cd   : > { %p10_p4 = scmp.ge.s32.totalorder %s13_s12, 5  }
 0x1cf   :  { %12 = sbr.rel (!%p10_p4) target bundleno = 1 (0x1), region = 68 }

// kernel: grcu_forward.4
= control target key start
LH: loop header
LB: loop body
LE: loop exit
PB: predicated region body
PF: predicated region fallthrough
CT: control target
= control target key end

     0   :  { %v718_v0 = vmov 0.0|0.0   ;;  %vm719_vm0 = vmmov 0   ;;  %v720_v3 = vmov 0.0   ;;  %vm35_vm1 = vcmask 130048   ;;  %s870_s0 = inlined_call_operand.vmem [shape: f32[3,8,128], index: 0, kind: input, shape index: {}]   ;;  %s871_s1 = inlined_call_operand.vmem [shape: f32[8,128], index: 1, kind: input, shape index: {}]   ;;  %s872_s2 = inlined_call_operand.vmem [shape: f32[24,16], index: 2, kind: input, shape index: {}]   ;;  %s873_s4 = inlined_call_operand.vmem [shape: f32[3,8,128], index: 4, kind: input, shape index: {}]   ;;  %s874_s3 = inlined_call_operand.vmem [shape: f32[8,8], index: 3, kind: input, shape index: {}]   ;;  %s875_s5 = inlined_call_operand.vmem [shape: f32[3,8,128], index: 5, kind: output, shape index: {}]  }
   0x1   :  { %676 = vmatprep.subr.bf16.mxu0 %v718_v0  ;;  %v24_v1 = vld [vmem:[%s871_s1] sm:$0xff]  ;;  %626 = vmatprep.mubr.msk.f32.mxu0 %vm719_vm0, %v720_v3  ;;  %v776_v6 = vld [vmem:[%s872_s2 + $0x8] sm:$0xff]  ;;  %v785_v7 = vld [vmem:[%s872_s2 + $0x10] sm:$0xff]  ;;  %vm140_vm2 = vcmask 64512  }
   0x2   :  { %v34_v2 = vld [vmem:[%s870_s0] sm:$0xff]  ;;  %679 = vmatprep.subr.bf16.mxu1 %v718_v0  ;;  %644 = vmatprep.mubr.msk.f32.mxu1 %vm719_vm0, %v720_v3  ;;  %v794_v10 = vld [vmem:[%s873_s4 + $0x8] sm:$0xff]  ;;  %v816_v27 = vld [vmem:[%s873_s4 + $0x10] sm:$0xff] }
   0x3   :  { %v677_v4 = vpack.c.bf16 %v24_v1, %v34_v2  ;;  %v766_v5 = vld [vmem:[%s872_s2] sm:$0xff]  ;;  %v585_v37 = vld [vmem:[%s870_s0 + $0x8] sm:$0xff] }
   0x4   :  { %v800_v19 = vld [vmem:[%s874_s3] sm:$0xff] }
   0x5   :  { %678 = vmatpush3.bf16.msra.mxu0 %v677_v4  ;;  %v810_v22 = vld [vmem:[%s873_s4] sm:$0xff] }
   0x6   :  { %635 = vmatprep.subr.mxu0 %v720_v3 }
   0x8   :  { %627 = vmatmul.mubr.msk.f32.vlgmr.msra.gmra.mrb[0].mxu0 %vm35_vm1, %v766_v5 }
   0x9   :  { %629 = vmatprep.mubr.msk.f32.mxu0 %vm719_vm0, %v720_v3 }
   0xc   :  { %630 = vmatmul.mubr.msk.f32.gmra.mrb[2].mxu0 %vm35_vm1, %v776_v6 }
   0xd   :  { %632 = vmatprep.mubr.msk.f32.mxu0 %vm719_vm0, %v720_v3 }
  0x10   :  { %633 = vmatmul.mubr.msk.f32.gmra.mrb[4].mxu0 %vm35_vm1, %v785_v7 }
  0x11   :  { %637 = vmatprep.mubr.msk.f32.mxu0 %vm719_vm0, %v720_v3 }
  0xdb   :  { %v111_v8 = vpop.f32.mrb[0].mxu0 }
  0xdc   :  { %v628_v9 = vpop.f32.mrb[1].mxu0  ;;  %v125_v23 = vadd.f32 %v111_v8, %v810_v22 }
  0xde   :  { %v582_v24 = vmul.f32 -1.442695, %v125_v23 }
  0xdf   :  { %v116_v11 = vpop.f32.mrb[2].mxu0 }
  0xe0   :  { %v132_v12 = vadd.f32 %v116_v11, %v794_v10  ;;  %v631_v13 = vpop.f32.mrb[3].mxu0 }
  0xe2   :  { %v583_v14 = vmul.f32 -1.442695, %v132_v12 }
  0xe3   :  { %v121_v20 = vpop.f32.mrb[4].mxu0 }
  0xe4   :  { %688 = vpow2.f32 %v583_v14  ;;  %v634_v21 = vpop.f32.mrb[5].mxu0 }
  0xee   :  { %v689_v15 = vpop.eup %688 }
  0xef   :  { %v136_v16 = vadd.f32 1.0, %v689_v15 }
  0xf1   :  { %690 = vrcp.f32 %v136_v16 }
  0xf2   :  { %692 = vpow2.f32 %v582_v24 }
  0xfb   :  { %v691_v17 = vpop.eup %690 }
  0xfc   :  { %v139_v18 = vmul.f32 %v691_v17, %v24_v1  ;;  %v693_v25 = vpop.eup %692 }
  0xfd   :  { %v129_v26 = vadd.f32 1.0, %v693_v25 }
  0xfe   :  { %636 = vmatpush3.msra.mxu0 %v139_v18 }
  0xff   :  { %638 = vmatmul.mubr.msk.f32.vlgmr.msra.gmra.mrb[6].mxu0 %vm140_vm2, %v800_v19  ;;  %653 = vmatprep.subr.mxu0 %v720_v3  ;;  %694 = vrcp.f32 %v129_v26 }
 0x100   :  { %655 = vmatprep.mubr.msk.f32.mxu0 %vm719_vm0, %v720_v3 }
 0x109   :  { %v695_v32 = vpop.eup %694 }
 0x10a   :  { %v217_v33 = vsub.f32 1.0, %v695_v32 }
 0x10c   :  { %v218_v35 = vmul.f32 %v217_v33, %v24_v1  ;;  %v593_v1 = vld [vmem:[%s870_s0 + $0x10] sm:$0xff] }
 0x1d2   :  { %v210_v28 = vpop.f32.mrb[6].mxu0 }
 0x1d3   :  { %v214_v29 = vadd.f32 %v210_v28, %v121_v20  ;;  %v639_v30 = vpop.f32.mrb[7].mxu0 }
 0x1d5   :  { %v215_v31 = vadd.f32 %v214_v29, %v816_v27 }
 0x1d7   :  { %696 = vtanh.f32 %v215_v31 }
 0x1e1   :  { %v697_v34 = vpop.eup %696 }
 0x1e2   :  { %v219_v36 = vmul.f32 %v697_v34, %v695_v32 }
 0x1e4   :  { %v220_v38 = vadd.f32 %v219_v36, %v218_v35 }
 0x1e6   :  { %221 = vst [vmem:[%s875_s5] sm:$0xff] %v220_v38  ;;  %v680_v39 = vpack.c.bf16 %v220_v38, %v585_v37 }
 0x1e8   :  { %681 = vmatpush3.bf16.msra.mxu1 %v680_v39 }
 0x1e9   :  { %682 = vmatprep.subr.bf16.mxu1 %v718_v0 }
 0x1eb   :  { %645 = vmatmul.mubr.msk.f32.vlgmr.msra.gmra.mrb[0].mxu1 %vm35_vm1, %v766_v5 }
 0x1ec   :  { %647 = vmatprep.mubr.msk.f32.mxu1 %vm719_vm0, %v720_v3 }
 0x1ef   :  { %648 = vmatmul.mubr.msk.f32.gmra.mrb[2].mxu1 %vm35_vm1, %v776_v6 }
 0x1f0   :  { %650 = vmatprep.mubr.msk.f32.mxu1 %vm719_vm0, %v720_v3 }
 0x1f3   :  { %651 = vmatmul.mubr.msk.f32.gmra.mrb[4].mxu1 %vm35_vm1, %v785_v7 }
 0x1f4   :  { %662 = vmatprep.mubr.msk.f32.mxu1 %vm719_vm0, %v720_v3 }
 0x2be   :  { %v290_v40 = vpop.f32.mrb[0].mxu1 }
 0x2bf   :  { %v646_v41 = vpop.f32.mrb[1].mxu1  ;;  %v304_v52 = vadd.f32 %v290_v40, %v810_v22 }
 0x2c1   :  { %v589_v53 = vmul.f32 -1.442695, %v304_v52 }
 0x2c2   :  { %v295_v42 = vpop.f32.mrb[2].mxu1 }
 0x2c3   :  { %v311_v43 = vadd.f32 %v295_v42, %v794_v10  ;;  %v649_v44 = vpop.f32.mrb[3].mxu1 }
 0x2c5   :  { %v590_v45 = vmul.f32 -1.442695, %v311_v43 }
 0x2c6   :  { %v300_v46 = vpop.f32.mrb[4].mxu1 }
 0x2c7   :  { %698 = vpow2.f32 %v590_v45  ;;  %v652_v47 = vpop.f32.mrb[5].mxu1 }
 0x2d1   :  { %v699_v48 = vpop.eup %698 }
 0x2d2   :  { %v315_v49 = vadd.f32 1.0, %v699_v48 }
 0x2d4   :  { %700 = vrcp.f32 %v315_v49 }
 0x2d5   :  { %702 = vpow2.f32 %v589_v53 }
 0x2de   :  { %v701_v50 = vpop.eup %700 }
 0x2df   :  { %v318_v51 = vmul.f32 %v701_v50, %v220_v38  ;;  %v703_v54 = vpop.eup %702 }
 0x2e0   :  { %v308_v55 = vadd.f32 1.0, %v703_v54 }
 0x2e1   :  { %654 = vmatpush3.msra.mxu0 %v318_v51 }
 0x2e2   :  { %656 = vmatmul.mubr.msk.f32.vlgmr.msra.gmra.mrb[8].mxu0 %vm140_vm2, %v800_v19  ;;  %671 = vmatprep.subr.mxu0 %v720_v3  ;;  %704 = vrcp.f32 %v308_v55 }
 0x2e3   :  { %673 = vmatprep.mubr.msk.f32.mxu0 %vm719_vm0, %v720_v3 }
 0x2ec   :  { %v705_v60 = vpop.eup %704 }
 0x2ed   :  { %v392_v61 = vsub.f32 1.0, %v705_v60 }
 0x2ef   :  { %v393_v0 = vmul.f32 %v392_v61, %v220_v38 }
 0x3b5   :  { %v385_v56 = vpop.f32.mrb[8].mxu0 }
 0x3b6   :  { %v389_v57 = vadd.f32 %v385_v56, %v300_v46  ;;  %v657_v58 = vpop.f32.mrb[9].mxu0 }
 0x3b8   :  { %v390_v59 = vadd.f32 %v389_v57, %v816_v27 }
 0x3ba   :  { %706 = vtanh.f32 %v390_v59 }
 0x3c4   :  { %v707_v62 = vpop.eup %706 }
 0x3c5   :  { %v394_v63 = vmul.f32 %v707_v62, %v705_v60 }
 0x3c7   :  { %v395_v2 = vadd.f32 %v394_v63, %v393_v0 }
 0x3c9   :  { %592 = vst [vmem:[%s875_s5 + $0x8] sm:$0xff] %v395_v2  ;;  %v683_v4 = vpack.c.bf16 %v395_v2, %v593_v1 }
 0x3cb   :  { %684 = vmatpush3.bf16.msra.mxu1 %v683_v4 }
 0x3ce   :  { %663 = vmatmul.mubr.msk.f32.vlgmr.msra.gmra.mrb[6].mxu1 %vm35_vm1, %v766_v5 }
 0x3cf   :  { %665 = vmatprep.mubr.msk.f32.mxu1 %vm719_vm0, %v720_v3 }
 0x3d2   :  { %666 = vmatmul.mubr.msk.f32.gmra.mrb[8].mxu1 %vm35_vm1, %v776_v6 }
 0x3d3   :  { %668 = vmatprep.mubr.msk.f32.mxu1 %vm719_vm0, %v720_v3 }
 0x3d6   :  { %669 = vmatmul.mubr.msk.f32.gmra.mrb[10].mxu1 %vm35_vm1, %v785_v7 }
 0x4a1   :  { %v466_v8 = vpop.f32.mrb[6].mxu1 }
 0x4a2   :  { %v664_v9 = vpop.f32.mrb[7].mxu1  ;;  %v480_v3 = vadd.f32 %v466_v8, %v810_v22 }
 0x4a4   :  { %v597_v7 = vmul.f32 -1.442695, %v480_v3 }
 0x4a5   :  { %v471_v11 = vpop.f32.mrb[8].mxu1 }
 0x4a6   :  { %v487_v12 = vadd.f32 %v471_v11, %v794_v10  ;;  %v667_v13 = vpop.f32.mrb[9].mxu1 }
 0x4a8   :  { %v598_v14 = vmul.f32 -1.442695, %v487_v12 }
 0x4a9   :  { %v476_v5 = vpop.f32.mrb[10].mxu1 }
 0x4aa   :  { %708 = vpow2.f32 %v598_v14  ;;  %v670_v15 = vpop.f32.mrb[11].mxu1 }
 0x4b4   :  { %v709_v16 = vpop.eup %708 }
 0x4b5   :  { %v491_v17 = vadd.f32 1.0, %v709_v16 }
 0x4b7   :  { %710 = vrcp.f32 %v491_v17 }
 0x4b8   :  { %712 = vpow2.f32 %v597_v7 }
 0x4c1   :  { %v711_v6 = vpop.eup %710 }
 0x4c2   :  { %v494_v18 = vmul.f32 %v711_v6, %v395_v2  ;;  %v713_v20 = vpop.eup %712 }
 0x4c3   :  { %v484_v10 = vadd.f32 1.0, %v713_v20 }
 0x4c4   :  { %672 = vmatpush3.msra.mxu0 %v494_v18 }
 0x4c5   :  { %674 = vmatmul.mubr.msk.f32.vlgmr.msra.gmra.mrb[10].mxu0 %vm140_vm2, %v800_v19  ;;  %714 = vrcp.f32 %v484_v10 }
 0x4cf   :  { %v715_v26 = vpop.eup %714 }
 0x4d0   :  { %v568_v28 = vsub.f32 1.0, %v715_v26 }
 0x4d2   :  { %v569_v30 = vmul.f32 %v568_v28, %v395_v2 }
 0x598   :  { %v561_v21 = vpop.f32.mrb[10].mxu0 }
 0x599   :  { %v565_v23 = vadd.f32 %v561_v21, %v476_v5  ;;  %v675_v24 = vpop.f32.mrb[11].mxu0 }
 0x59b   :  { %v566_v25 = vadd.f32 %v565_v23, %v816_v27 }
 0x59d   :  { %716 = vtanh.f32 %v566_v25 }
 0x5a7   :  { %v717_v29 = vpop.eup %716 }
 0x5a8   :  { %v570_v31 = vmul.f32 %v717_v29, %v715_v26 }
 0x5aa   :  { %v571_v32 = vadd.f32 %v570_v31, %v569_v30 }
 0x5ac   :  { %600 = vst [vmem:[%s875_s5 + $0x10] sm:$0xff] %v571_v32 }

</bundles_post_ra>
